<compile_context>
chip_gen: v7x
topology: tpu7x:2x2x1
jax: 0.10.0
libtpu: 0.0.40
codegen_flags: <defaults>
</compile_context>

<pallas_src>
from functools import partial

import jax
import jax.numpy as jnp
from jax.experimental import pallas as pl
from jax.experimental.pallas import tpu as pltpu


def _accuracy_kernel(pred_ref, tgt_ref, out_ref, *, topk, thr, n_rows,
                     blocks_per_shard):
    c = pl.program_id(0)          # TensorCore shard (parallel)
    i = pl.program_id(1)          # batch-block step within shard (reduction)

    @pl.when(i == 0)
    def _init():
        for j in range(len(topk)):
            out_ref[0, j] = jnp.int32(0)

    pred = pred_ref[...]                                  # (TN, C) native dtype
    tgt = tgt_ref[...]                                    # (TN, 1) int32
    TN, C = pred.shape

    col = jax.lax.broadcasted_iota(jnp.int32, (TN, C), 1)
    tmask = col == tgt                                    # one-hot of target

    # Target-class score per sample: exact even in bf16 (single nonzero term).
    score_t = jnp.sum(jnp.where(tmask, pred, jnp.zeros((), pred.dtype)),
                      axis=1, keepdims=True)              # (TN, 1)

    # Fused rank reduction (lower class index wins ties): (TN, 1) int32.
    ahead = (pred > score_t) | ((pred == score_t) & (col < tgt))
    rank = jnp.sum(ahead.astype(jnp.int32), axis=1, keepdims=True)

    # Mask rows past the end of the batch (partial / duplicated edge blocks).
    row = jax.lax.broadcasted_iota(jnp.int32, (TN, 1), 0)
    block_idx = c * blocks_per_shard + i                  # logical block index
    row_valid = (block_idx * TN + row) < n_rows

    valid = (score_t.astype(jnp.float32) > jnp.float32(thr)) & row_valid

    for j, k in enumerate(topk):                          # static unroll
        correct_k = jnp.logical_and(rank < k, valid)
        out_ref[0, j] = out_ref[0, j] + jnp.sum(correct_k.astype(jnp.int32))


def accuracy_pallas(pred, target, topk=(1,), thr=0.0,
                    target_tile_bytes=None, tile_rows=None):
    """Returns a list of per-k accuracies (each a shape-(1,) float32 array)."""
    pred = jnp.asarray(pred)
    if not jnp.issubdtype(pred.dtype, jnp.floating):
        pred = pred.astype(jnp.float32)                   # int logits -> f32
    N, C = pred.shape
    tgt2d = jnp.asarray(target, jnp.int32).reshape(N, 1)

    topk = tuple(int(k) for k in topk)
    nk = len(topk)

    # ---- chip-aware VMEM budget (v7x has 64 MiB/TC, v5e/v6e 128 MiB) ----
    try:
        vmem_cap = int(pltpu.get_tpu_info().vmem_capacity_bytes)
    except Exception:  # pragma: no cover - conservative fallback
        vmem_cap = 64 << 20
    vmem_budget = max(16 << 20, min(vmem_cap - (8 << 20), 100 << 20))

    # ---- byte-targeted, sublane-packed tile size ----
    itemsize = int(pred.dtype.itemsize)
    row_bytes = C * itemsize
    if target_tile_bytes is None:
        target_tile_bytes = (4 << 20) if vmem_cap <= (64 << 20) else (6 << 20)

    if tile_rows is not None:                             # explicit override
        tn = max(8, (int(tile_rows) // 8) * 8)
    else:
        tn = max(32, (int(target_tile_bytes) // max(row_bytes, 1)) // 32 * 32)

    def _tile_cost(t):
        # 2x double-buffered input tiles + ~4x f32-equiv intermediates + slack.
        return 2 * t * row_bytes + 4 * t * C * 4 + (2 << 20)

    while tn > 32 and _tile_cost(tn) > vmem_budget:
        tn = max(32, ((tn // 2) // 32) * 32)

    if N <= tn:
        tn = N                                            # full-batch block

    nb = pl.cdiv(N, tn)                                   # total batch blocks
    num_shards = 2 if nb >= 2 else 1                      # v7x: 2 TensorCores
    bps = pl.cdiv(nb, num_shards)                         # blocks per shard
    grid = (num_shards, bps)

    def _in_map(c, i):
        # Clamp duplicated tail blocks of the second shard; their rows are
        # fully masked in-kernel via the global row index.
        return (jnp.minimum(c * bps + i, nb - 1), 0)

    vmem_limit = int(min(max(_tile_cost(tn), 16 << 20), vmem_budget))

    kernel = partial(_accuracy_kernel, topk=topk, thr=float(thr),
                     n_rows=N, blocks_per_shard=bps)
    counts = pl.pallas_call(
        kernel,
        out_shape=jax.ShapeDtypeStruct((num_shards, nk), jnp.int32),
        grid=grid,
        in_specs=[
            pl.BlockSpec((tn, C), _in_map),
            pl.BlockSpec((tn, 1), _in_map),
        ],
        out_specs=pl.BlockSpec((1, nk), lambda c, i: (c, 0),
                               memory_space=pltpu.MemorySpace.SMEM),
        compiler_params=pltpu.CompilerParams(
            dimension_semantics=("parallel", "arbitrary"),
            vmem_limit_bytes=vmem_limit,
        ),
    )(pred, tgt2d)

    totals = jnp.sum(counts, axis=0).astype(jnp.float32) * jnp.float32(100.0 / N)
    return [totals[j:j + 1] for j in range(nk)]


class Accuracy:
    """JAX/Pallas equivalent of the torch Accuracy module (thrs=0.0)."""

    def __init__(self, topk=(1,)):
        self.topk = topk

    def __call__(self, pred, target):
        topk = self.topk
        if isinstance(topk, int):
            return accuracy_pallas(pred, target, topk=(topk,), thr=0.0)[0]
        return accuracy_pallas(pred, target, topk=tuple(topk), thr=0.0)


def _accuracy_ref(pred, target, topk, thr=0.0):
    """Pure-jnp reference mirroring accuracy_torch semantics."""
    pred = jnp.asarray(pred, jnp.float32)
    target = jnp.asarray(target, jnp.int32)
    N = pred.shape[0]
    maxk = max(topk)
    vals, idx = jax.lax.top_k(pred, maxk)                 # (N, maxk)
    correct = idx == target[:, None]
    res = []
    for k in topk:
        ck = jnp.logical_and(correct[:, :k], vals[:, :k] > thr)
        res.append(jnp.sum(ck.astype(jnp.float32)).reshape(1) * (100.0 / N))
    return res


if __name__ == "__main__":
    # --- test 1: small single-block path -----------------------------------
    key = jax.random.PRNGKey(0)
    kp, kt = jax.random.split(key)
    N, C = 8, 16
    pred = jax.random.normal(kp, (N, C), dtype=jnp.float32)
    target = jax.random.randint(kt, (N,), 0, C, dtype=jnp.int32)

    module = Accuracy(topk=(1, 3))
    res = [jax.block_until_ready(r) for r in module(pred, target)]
    ref = _accuracy_ref(pred, target, (1, 3))
    for r, rr in zip(res, ref):
        assert jnp.allclose(r, rr, atol=1e-4), (r, rr)

    # --- test 2: tiled path (partial tile masking, 2-shard split, accumulation)
    kp2, kt2 = jax.random.split(jax.random.PRNGKey(1))
    N2, C2 = 20, 32
    pred2 = jax.random.normal(kp2, (N2, C2), dtype=jnp.float32)
    target2 = jax.random.randint(kt2, (N2,), 0, C2, dtype=jnp.int32)
    res2 = [jax.block_until_ready(r)
            for r in accuracy_pallas(pred2, target2, topk=(1, 5), tile_rows=8)]
    ref2 = _accuracy_ref(pred2, target2, (1, 5))
    for r, rr in zip(res2, ref2):
        assert jnp.allclose(r, rr, atol=1e-4), (r, rr)

    # --- test 3: bf16 logits (native-dtype compute path) --------------------
    pred3 = pred2.astype(jnp.bfloat16)
    res3 = [jax.block_until_ready(r)
            for r in accuracy_pallas(pred3, target2, topk=(1, 5), tile_rows=8)]
    ref3 = _accuracy_ref(pred3, target2, (1, 5))
    for r, rr in zip(res3, ref3):
        assert jnp.allclose(r, rr, atol=1e-4), (r, rr)

    print("KERNEL_OK")
</pallas_src>

<mosaic_0001>
module attributes {stable_mosaic.version = 11 : i64} {
  func.func @_accuracy_kernel(%arg0: i32, %arg1: i32, %arg2: memref<8x16xf32, #tpu.memory_space<vmem>>, %arg3: memref<8x1xi32, #tpu.memory_space<vmem>>, %arg4: memref<1x2xi32, #tpu.memory_space<smem>>) attributes {dimension_semantics = [#tpu.dimension_semantics<parallel>, #tpu.dimension_semantics<arbitrary>], iteration_bounds = array<i64: 1, 1>, scalar_prefetch = 0 : i64, scratch_operands = 0 : i64, tpu.core_type = #tpu.core_type<tc>, window_params = [{transform_indices = @transform_0, window_bounds = array<i64: 8, 16>}, {transform_indices = @transform_1, window_bounds = array<i64: 8, 1>}, {transform_indices = @transform_2, window_bounds = array<i64: 1, 2>}]} {
    %c0_i32 = arith.constant 0 : i32
    %0 = arith.cmpi eq, %arg1, %c0_i32 : i32
    %1 = arith.extui %0 : i1 to i32
    %c0_i32_0 = arith.constant 0 : i32
    %2 = arith.cmpi ne, %1, %c0_i32_0 : i32
    scf.if %2 {
      %c0_i32_18 = arith.constant 0 : i32
      %c0_19 = arith.constant 0 : index
      %c0_20 = arith.constant 0 : index
      %56 = memref.load %arg4[%c0_19, %c0_20] : memref<1x2xi32, #tpu.memory_space<smem>>
      memref.store %c0_i32_18, %arg4[%c0_19, %c0_20] : memref<1x2xi32, #tpu.memory_space<smem>>
      %c0_i32_21 = arith.constant 0 : i32
      %c0_22 = arith.constant 0 : index
      %c1_23 = arith.constant 1 : index
      %57 = memref.load %arg4[%c0_22, %c1_23] : memref<1x2xi32, #tpu.memory_space<smem>>
      memref.store %c0_i32_21, %arg4[%c0_22, %c1_23] : memref<1x2xi32, #tpu.memory_space<smem>>
    } else {
    }
    %c0 = arith.constant 0 : index
    %c0_1 = arith.constant 0 : index
    %3 = vector.load %arg2[%c0, %c0_1] : memref<8x16xf32, #tpu.memory_space<vmem>>, vector<8x16xf32>
    %c0_2 = arith.constant 0 : index
    %c0_3 = arith.constant 0 : index
    %4 = vector.load %arg3[%c0_2, %c0_3] : memref<8x1xi32, #tpu.memory_space<vmem>>, vector<8x1xi32>
    %5 = tpu.iota {dimensions = array<i32: 1>} : vector<8x16xi32>
    %6 = vector.broadcast %4 : vector<8x1xi32> to vector<8x16xi32>
    %7 = arith.cmpi eq, %5, %6 : vector<8x16xi32>
    %cst = arith.constant 0.000000e+00 : f32
    %8 = vector.broadcast %cst : f32 to vector<8x16xf32>
    %9 = arith.select %7, %3, %8 : vector<8x16xi1>, vector<8x16xf32>
    %cst_4 = arith.constant dense<0.000000e+00> : vector<8xf32>
    %10 = vector.multi_reduction <add>, %9, %cst_4 [1] : vector<8x16xf32> to vector<8xf32>
    %11 = vector.shape_cast %10 : vector<8xf32> to vector<8x1xf32>
    %12 = vector.broadcast %11 : vector<8x1xf32> to vector<8x16xf32>
    %13 = arith.cmpf ogt, %3, %12 : vector<8x16xf32>
    %14 = vector.broadcast %11 : vector<8x1xf32> to vector<8x16xf32>
    %15 = arith.cmpf oeq, %3, %14 : vector<8x16xf32>
    %16 = vector.broadcast %4 : vector<8x1xi32> to vector<8x16xi32>
    %17 = arith.cmpi slt, %5, %16 : vector<8x16xi32>
    %18 = arith.andi %15, %17 : vector<8x16xi1>
    %19 = arith.ori %13, %18 : vector<8x16xi1>
    %20 = arith.extui %19 : vector<8x16xi1> to vector<8x16xi32>
    %cst_5 = arith.constant dense<0> : vector<8xi32>
    %21 = vector.multi_reduction <add>, %20, %cst_5 [1] : vector<8x16xi32> to vector<8xi32>
    %22 = vector.shape_cast %21 : vector<8xi32> to vector<8x1xi32>
    %23 = tpu.iota {dimensions = array<i32: 0>} : vector<8x1xi32>
    %c1_i32 = arith.constant 1 : i32
    %24 = arith.muli %arg0, %c1_i32 : i32
    %25 = arith.addi %24, %arg1 : i32
    %c8_i32 = arith.constant 8 : i32
    %26 = arith.muli %25, %c8_i32 : i32
    %27 = vector.broadcast %26 : i32 to vector<8x1xi32>
    %28 = arith.addi %27, %23 : vector<8x1xi32>
    %c8_i32_6 = arith.constant 8 : i32
    %29 = vector.broadcast %c8_i32_6 : i32 to vector<8x1xi32>
    %30 = arith.cmpi slt, %28, %29 : vector<8x1xi32>
    %cst_7 = arith.constant 0.000000e+00 : f32
    %31 = vector.broadcast %cst_7 : f32 to vector<8x1xf32>
    %32 = arith.cmpf ogt, %11, %31 : vector<8x1xf32>
    %33 = arith.andi %32, %30 : vector<8x1xi1>
    %c1_i32_8 = arith.constant 1 : i32
    %34 = vector.broadcast %c1_i32_8 : i32 to vector<8x1xi32>
    %35 = arith.cmpi slt, %22, %34 : vector<8x1xi32>
    %36 = arith.andi %35, %33 : vector<8x1xi1>
    %c0_9 = arith.constant 0 : index
    %c0_10 = arith.constant 0 : index
    %37 = memref.load %arg4[%c0_9, %c0_10] : memref<1x2xi32, #tpu.memory_space<smem>>
    %38 = arith.extui %36 : vector<8x1xi1> to vector<8x1xi32>
    %39 = vector.shape_cast %38 : vector<8x1xi32> to vector<1x8x1xi32>
    %cst_11 = arith.constant dense<0> : vector<1xi32>
    %40 = vector.multi_reduction <add>, %39, %cst_11 [1, 2] : vector<1x8x1xi32> to vector<1xi32>
    %41 = vector.shape_cast %40 : vector<1xi32> to vector<1x1x1xi32>
    %42 = vector.extract %41[0, 0, 0] : i32 from vector<1x1x1xi32>
    %43 = arith.addi %37, %42 : i32
    %c0_12 = arith.constant 0 : index
    %c0_13 = arith.constant 0 : index
    %44 = memref.load %arg4[%c0_12, %c0_13] : memref<1x2xi32, #tpu.memory_space<smem>>
    memref.store %43, %arg4[%c0_12, %c0_13] : memref<1x2xi32, #tpu.memory_space<smem>>
    %c3_i32 = arith.constant 3 : i32
    %45 = vector.broadcast %c3_i32 : i32 to vector<8x1xi32>
    %46 = arith.cmpi slt, %22, %45 : vector<8x1xi32>
    %47 = arith.andi %46, %33 : vector<8x1xi1>
    %c0_14 = arith.constant 0 : index
    %c1 = arith.constant 1 : index
    %48 = memref.load %arg4[%c0_14, %c1] : memref<1x2xi32, #tpu.memory_space<smem>>
    %49 = arith.extui %47 : vector<8x1xi1> to vector<8x1xi32>
    %50 = vector.shape_cast %49 : vector<8x1xi32> to vector<1x8x1xi32>
    %cst_15 = arith.constant dense<0> : vector<1xi32>
    %51 = vector.multi_reduction <add>, %50, %cst_15 [1, 2] : vector<1x8x1xi32> to vector<1xi32>
    %52 = vector.shape_cast %51 : vector<1xi32> to vector<1x1x1xi32>
    %53 = vector.extract %52[0, 0, 0] : i32 from vector<1x1x1xi32>
    %54 = arith.addi %48, %53 : i32
    %c0_16 = arith.constant 0 : index
    %c1_17 = arith.constant 1 : index
    %55 = memref.load %arg4[%c0_16, %c1_17] : memref<1x2xi32, #tpu.memory_space<smem>>
    memref.store %54, %arg4[%c0_16, %c1_17] : memref<1x2xi32, #tpu.memory_space<smem>>
    return
  }
  func.func @transform_0(%arg0: i32, %arg1: i32) -> (i32, i32) {
    %c1_i32 = arith.constant 1 : i32
    %0 = arith.muli %arg0, %c1_i32 : i32
    %1 = arith.addi %0, %arg1 : i32
    %c0_i32 = arith.constant 0 : i32
    %2 = arith.minsi %1, %c0_i32 : i32
    %c0_i32_0 = arith.constant 0 : i32
    %c0_i32_1 = arith.constant 0 : i32
    return %2, %c0_i32_0 : i32, i32
  }
  func.func @transform_1(%arg0: i32, %arg1: i32) -> (i32, i32) {
    %c1_i32 = arith.constant 1 : i32
    %0 = arith.muli %arg0, %c1_i32 : i32
    %1 = arith.addi %0, %arg1 : i32
    %c0_i32 = arith.constant 0 : i32
    %2 = arith.minsi %1, %c0_i32 : i32
    %c0_i32_0 = arith.constant 0 : i32
    %c0_i32_1 = arith.constant 0 : i32
    return %2, %c0_i32_0 : i32, i32
  }
  func.func @transform_2(%arg0: i32, %arg1: i32) -> (i32, i32) {
    %c0_i32 = arith.constant 0 : i32
    %c0_i32_0 = arith.constant 0 : i32
    return %arg0, %c0_i32 : i32, i32
  }
}

</mosaic_0001>

<bundles_post_ra>
// kernel: tpu_custom_call.1
= control target key start
LH: loop header
LB: loop body
LE: loop exit
PB: predicated region body
PF: predicated region fallthrough
CT: control target
= control target key end

     0   :  { %s224_s0 = inlined_call_operand.vmem [shape: f32[8,16], index: 0, kind: input, shape index: {}]   ;;  %s225_s1 = inlined_call_operand.vmem [shape: s32[8,1], index: 1, kind: input, shape index: {}]   ;;  %s226_s2 = inlined_call_operand.hbm [shape: s32[1,2], index: 2, kind: output, shape index: {}]  }
   0x1   :  { %v75_v0 = vld [vmem:[%s225_s1] sm:$0xff] }
   0x2   :  { %7 = vsyncpa [#allocation3], 0  ;;  %v189_v1 = vmov 0   ;;  %v76_v2 = vlaneseq  ;;  %v74_v4 = vld [vmem:[%s224_s0] sm:$0xff]  ;;  %vm83_vm0 = vcmask 130048   ;;  %s177_s15 = scalar_lea.hbm %s226_s2, 16 }
   0x3   :  { %176 = vset.pattern.permute.xlu0 %v189_v1  ;;  %p178_p0 = scmp.ne.s32.totalorder %s226_s2, %s177_s15  ;;  %p181_p1 = scmp.lt.u32.totalorder %s177_s15, %s226_s2 }
   0x4   :  { %79 = vperm.xlu0 %176, %v75_v0   ;;  %v77_v3 = vand.u32 127, %v76_v2 }
   0x5   :  { %p183_p2 = pnand %p181_p1, %p178_p0 }
  0x83   :  { %v80_v5 = vpop.permute.xlu0 %79 }
  0x84   :  { %vm81_vm1 = vcmp.eq.s32.totalorder %v77_v3, %v80_v5  ;;  %vm89_vm2 = vcmp.lt.s32.totalorder %v77_v3, %v80_v5 }
  0x85   :  { %v82_v6 = vsel %vm81_vm1, %v74_v4, 0.0 }
  0x86   :  { %v84_v7 = vsel %vm83_vm0, %v82_v6, 0.0 }
  0x87   :  { %85 = vadd.xlane.f32.xlu0 %v84_v7 }
 0x114   :  { %v86_v8 = vpop.xlane.xlu0 %85 }
 0x115   :  { %vm87_vm3 = vcmp.gt.f32.partialorder %v74_v4, %v86_v8  ;;  %vm88_vm4 = vcmp.eq.f32.partialorder %v74_v4, %v86_v8  ;;  %vm113_vm7 = vcmp.gt.f32.partialorder %v86_v8, 0.0 }
 0x116   :  { %vm90_vm5 = vmand %vm88_vm4, %vm89_vm2 }
 0x117   :  { %vm91_vm6 = vmor %vm87_vm3, %vm90_vm5 }
 0x118   :  { %v92_v9 = vsel %vm91_vm6, 1, %v189_v1 }
 0x119   :  { %v93_v10 = vsel %vm83_vm0, %v92_v9, 0 }
 0x11a   :  { %v95_v11 = vshrl.u32 %v93_v10, 16  ;;  %v94_v13 = vand.u32 65535, %v93_v10 }
 0x11c   :  { %v97_v12 = vcvt.s32.f32 %v95_v11  ;;  %v96_v14 = vcvt.s32.f32 %v94_v13 }
 0x11e   :  { %100 = vadd.xlane.f32.xlu1 %v97_v12 }
 0x122   :  { %98 = vadd.xlane.f32.xlu1 %v96_v14 }
 0x1ab   :  { %v101_v15 = vpop.xlane.xlu1 %100 }
 0x1ac   :  { %v103_v16 = vcvt.f32.s32 %v101_v15 }
 0x1ae   :  { %v104_v18 = vshll.u32 %v103_v16, 16 }
 0x1af   :  { %v99_v17 = vpop.xlane.xlu1 %98 }
 0x1b0   :  { %v102_v19 = vcvt.f32.s32 %v99_v17 }
 0x1b2   :  { %v105_v20 = vadd.s32 %v104_v18, %v102_v19 }
 0x1b4   :  { %vm115_vm8 = vcmp.lt.s32.totalorder %v105_v20, 1  ;;  %vm129_vm9 = vcmp.lt.s32.totalorder %v105_v20, 3 }
 0x1b5   :  { %vm116_vm10 = vmand %vm115_vm8, %vm113_vm7 }
 0x1b6   :  { %vm130_vm11 = vmand %vm129_vm9, %vm113_vm7  ;;  %v118_v21 = vsel %vm116_vm10, 1, %v189_v1 }
 0x1b7   :  { %v132_v22 = vsel %vm130_vm11, 1, %v189_v1  ;;  %v119_v23 = vrot.slane %v118_v21, 4 }
 0x1b8   :  { %v133_v24 = vrot.slane %v132_v22, 4 }
 0x1b9   :  { %v120_v25 = vadd.s32 %v119_v23, %v118_v21 }
 0x1ba   :  { %v134_v26 = vadd.s32 %v133_v24, %v132_v22 }
 0x1bb   :  { %v121_v27 = vrot.slane %v120_v25, 2 }
 0x1bc   :  { %v135_v28 = vrot.slane %v134_v26, 2 }
 0x1bd   :  { %v122_v29 = vadd.s32 %v121_v27, %v120_v25 }
 0x1be   :  { %v136_v30 = vadd.s32 %v135_v28, %v134_v26 }
 0x1bf   :  { %v123_v31 = vrot.slane %v122_v29, 1 }
 0x1c0   :  { %v137_v32 = vrot.slane %v136_v30, 1 }
 0x1c1   :  { %v124_v33 = vadd.s32 %v123_v31, %v122_v29 }
 0x1c2   :  { %v138_v34 = vadd.s32 %v137_v32, %v136_v30 }
 0x1c3   :  { %169 = vpush %v124_v33 }
 0x1c4   :  { %171 = vpush %v138_v34 }
 0x1f4   :  { %s170_s0 = spop %169 }
 0x1f5   :  { %s172_s1 = spop %171  ;;  %128 = sst [smem:[#allocation2]] %s170_s0 }
 0x1f6   :  { %142 = sst [smem:[#allocation2 + $0x1]] %s172_s1 }
 0x1f7   :  { %186 = shalt.err (!%p183_p2)
}
 0x1f8   :  { %s190_s20 = smov [#allocation2]  }
 0x1f9   :  { %150 = dma.smem_to_hbm %s190_s20, 16, %s226_s2, [#allocation3]  }
 0x1fa   :  { %187 = dma.done.wait [#allocation3], 16  }
 0x1fb   :  { %188 = vsyncadd [#allocation3], 4294967280 }
 0x1fc   :  { %154 = sfence }
 0x1fd   :  { %155 = vsyncpa [#allocation3], 1 }

</bundles_post_ra>
